<compile_context>
chip_gen: v6e
topology: v6e:2x2x1
jax: 0.10.0
libtpu: 0.0.40
codegen_flags: <defaults>
</compile_context>

<pallas_src>
import functools

import jax
import jax.numpy as jnp
from jax import lax
from jax.experimental import pallas as pl
from jax.experimental.pallas import tpu as pltpu

# ----------------------------- config (synthetic cfg.*) -----------------------------
POOLING_SIZE = 2                 # cfg.POOLING_SIZE (kept small for the synthetic run)
SPATIAL_SCALE = 1.0 / 16.0       # PSRoIPool spatial_scale
N_CLASSES = 21                   # the torch code hardcodes .view(-1, 21)
CLASS_AGNOSTIC = True
BOX_NUM_CLASSES = 1 if CLASS_AGNOSTIC else N_CLASSES
C_BASE = 32                      # dout_base_model (stub)
C_NEW = 32                       # RCNN_conv_new output channels (stub)
N_ROIS_PER_IMAGE = 8

PP = POOLING_SIZE * POOLING_SIZE
N_LOC = 4 * BOX_NUM_CLASSES
OUT_DIM = N_CLASSES + N_LOC      # combined cls||bbox per-roi output dims (25)
HEAD_PAD = 128                   # lane-dense padded output width
TILE_M = 1024                    # conv row tile (mem-bound 1x1 conv: bigger is better)
VMEM_LIMIT = 32 * 1024 * 1024    # safe on v5e/v6e/v7x

assert OUT_DIM <= HEAD_PAD

VMEM_SPEC = pl.BlockSpec(memory_space=pltpu.MemorySpace.VMEM)


# ----------------------------- 1x1 conv (row-tiled matmul) -----------------------------

def _conv1x1_kernel(x_ref, w_ref, b_ref, o_ref, *, relu):
    """Y = X @ W + b (optionally ReLU). bf16 operands, f32 accumulate, f32 epilogue."""
    y = jnp.dot(x_ref[...], w_ref[...], preferred_element_type=jnp.float32)
    y = y + b_ref[...]
    if relu:
        y = jnp.maximum(y, 0.0)
    o_ref[...] = y.astype(o_ref.dtype)


def conv1x1_nhwc(x_nhwc, w, b, *, relu=False, out_dtype=jnp.float32):
    """1x1 convolution on an NHWC feature map (no layout transposes)."""
    n, h, wd, cin = x_nhwc.shape
    cout = w.shape[1]
    m = n * h * wd
    x2d = x_nhwc.reshape(m, cin).astype(jnp.bfloat16)        # free reshape (NHWC contiguous)
    w2d = w.astype(jnp.bfloat16)
    b2d = b.reshape(1, cout).astype(jnp.float32)

    tm = m if m <= TILE_M else TILE_M
    grid = (pl.cdiv(m, tm),)
    out = pl.pallas_call(
        functools.partial(_conv1x1_kernel, relu=relu),
        out_shape=jax.ShapeDtypeStruct((m, cout), out_dtype),
        grid=grid,
        in_specs=[pl.BlockSpec((tm, cin), lambda i: (i, 0)),
                  pl.BlockSpec((cin, cout), lambda i: (0, 0)),
                  pl.BlockSpec((1, cout), lambda i: (0, 0))],
        out_specs=pl.BlockSpec((tm, cout), lambda i: (i, 0)),
        compiler_params=pltpu.CompilerParams(
            dimension_semantics=("parallel",),
            vmem_limit_bytes=VMEM_LIMIT),
    )(x2d, w2d, b2d)
    return out.reshape(n, h, wd, cout)


# ----------------------------- fused conv_new + PSRoIPool + AvgPool + heads -----------------------------

def _psroi_head_kernel(rois_ref, base_ref, wn_ref, bn_ref, wb_ref, bb_ref, o_ref,
                       *, pool, fh, fw, scale):
    """Per image: RCNN_conv_new (1x1+ReLU) prologue, PSRoIPool(group_size=P),
    AvgPool2d(P) and the 1x1 cls/bbox head convs, all fused.

    Head convs are linear, so we pool the C_NEW features per (roi, bin) first
    (one bf16 MXU mask-matmul) and then apply the fused (cls || bbox) per-bin
    weights with ONE dot over K = PP*C_NEW -- equal (up to float reassociation)
    to conv-then-pool.

    rois_ref: (1, NR, 5) f32      base_ref: (1, FH*FW, C_BASE) bf16
    wn_ref:   (C_BASE, C_NEW) bf16    bn_ref: (1, C_NEW) f32
    wb_ref:   (PP*C_NEW, 128) bf16    bb_ref: (PP, 128) f32
    o_ref:    (1, NR, 128) f32 = [cls scores 21 | bbox pred 4 | zero pad]
    """
    nr = rois_ref.shape[1]
    pp = pool * pool
    hw = fh * fw
    cnew = wn_ref.shape[1]

    # --- conv_new prologue (stays in VMEM; no HBM round trip, no narrow stores) ---
    base = base_ref[0]                                            # (HW, C_BASE) bf16
    feat_f32 = jnp.dot(base, wn_ref[...],
                       preferred_element_type=jnp.float32) + bn_ref[...]
    feat = jnp.maximum(feat_f32, 0.0).astype(jnp.bfloat16)        # (HW, C_NEW)

    rois = rois_ref[0]                                            # (NR, 5)

    def rnd(v):                                                   # C round(): half away from zero
        return jnp.sign(v) * jnp.floor(jnp.abs(v) + 0.5)

    x1 = rnd(rois[:, 1:2]) * scale                                # (NR, 1)
    y1 = rnd(rois[:, 2:3]) * scale
    x2 = (rnd(rois[:, 3:4]) + 1.0) * scale
    y2 = (rnd(rois[:, 4:5]) + 1.0) * scale
    bin_h = jnp.maximum(y2 - y1, 0.1) * (1.0 / pool)
    bin_w = jnp.maximum(x2 - x1, 0.1) * (1.0 / pool)

    gi = lax.broadcasted_iota(jnp.float32, (1, pool), 1)          # (1, P)
    hs = jnp.clip(jnp.floor(gi * bin_h + y1), 0.0, float(fh))     # (NR, P)
    he = jnp.clip(jnp.ceil((gi + 1.0) * bin_h + y1), 0.0, float(fh))
    ws = jnp.clip(jnp.floor(gi * bin_w + x1), 0.0, float(fw))
    we = jnp.clip(jnp.ceil((gi + 1.0) * bin_w + x1), 0.0, float(fw))

    # flatten (roi, bin) pairs to rows: row = r*PP + gh*P + gw
    hs_b = jnp.broadcast_to(hs[:, :, None], (nr, pool, pool)).reshape(nr * pp, 1)
    he_b = jnp.broadcast_to(he[:, :, None], (nr, pool, pool)).reshape(nr * pp, 1)
    ws_b = jnp.broadcast_to(ws[:, None, :], (nr, pool, pool)).reshape(nr * pp, 1)
    we_b = jnp.broadcast_to(we[:, None, :], (nr, pool, pool)).reshape(nr * pp, 1)

    # bin membership mask over flattened spatial HW (0/1 -> exact in bf16)
    hw_iota = lax.broadcasted_iota(jnp.int32, (1, hw), 1)
    yy = (hw_iota // fw).astype(jnp.float32)                      # (1, HW)
    xx = (hw_iota % fw).astype(jnp.float32)
    mask = ((yy >= hs_b) & (yy < he_b) &
            (xx >= ws_b) & (xx < we_b)).astype(jnp.float32)       # (NR*PP, HW)
    mask_bf = mask.astype(jnp.bfloat16)

    # MXU (bf16): sum of features over every (roi, bin) region, then mean over the bin.
    pooled = jnp.dot(mask_bf, feat, preferred_element_type=jnp.float32)   # (NR*PP, C_NEW)
    area = jnp.maximum((he_b - hs_b) * (we_b - ws_b), 1.0)        # >=1 when non-empty
    pooled = pooled / area                                        # exact division (parity w/ ref)
    nonempty = ((he_b > hs_b) & (we_b > ws_b)).astype(jnp.float32)  # (NR*PP, 1)

    # gate empty bins, flatten (roi, bin*chan) and apply the whole fused head in ONE dot.
    pooled_g = (pooled * nonempty).reshape(nr, pp * cnew).astype(jnp.bfloat16)
    head = jnp.dot(pooled_g, wb_ref[...], preferred_element_type=jnp.float32)  # (NR, 128)
    bias = jnp.dot(nonempty.reshape(nr, pp), bb_ref[...],
                   preferred_element_type=jnp.float32)                          # (NR, 128)

    # AvgPool2d(P, P) over the P*P bins (empty bins contributed exactly 0).
    o_ref[0] = (head + bias) * (1.0 / pp)


def make_bin_head_weights(w_cls, b_cls, w_bbox, b_bbox, pool, wpad=HEAD_PAD):
    """Precompute (once, outside the forward) the fused per-bin head weights.

    PSRoI channel layout is c = d*P*P + bin, so W_j[:, d] = w_head[:, d*PP + j].
    Returned flattened as (PP*C_NEW, 128) bf16 rows ordered [bin, chan] to match
    the kernel's (NR, PP*C_NEW) pooled flattening; bias as (PP, 128) f32.
    """
    w_head = jnp.concatenate([w_cls, w_bbox], axis=1)             # (C_NEW, OUT_DIM*PP)
    b_head = jnp.concatenate([b_cls, b_bbox], axis=0)             # (OUT_DIM*PP,)
    pp = pool * pool
    cnew = w_head.shape[0]
    out_dim = w_head.shape[1] // pp
    w_bins = jnp.zeros((pp, cnew, wpad), jnp.float32)
    b_bins = jnp.zeros((pp, wpad), jnp.float32)
    for j in range(pp):
        w_bins = w_bins.at[j, :, :out_dim].set(w_head[:, j::pp])
        b_bins = b_bins.at[j, :out_dim].set(b_head[j::pp])
    return w_bins.reshape(pp * cnew, wpad).astype(jnp.bfloat16), b_bins


def psroi_heads(base_nhwc, rois, w_new, b_new, w_bins_flat, b_bins,
                *, pool=POOLING_SIZE, scale=SPATIAL_SCALE):
    """Fused conv_new + PSRoI cls/bbox heads.
    base_nhwc: (N, FH, FW, C_BASE) bf16   rois: (N, NR, 5) f32.

    NOTE: assumes rois[b, :, 0] == b (true for RPN proposals / this module's ROI
    layout), so the grid's batch axis indexes the feature map directly and only
    that image's block is DMA'd per step (no per-ROI feature replication).
    """
    n, fh, fw, cbase = base_nhwc.shape
    nr = rois.shape[1]
    cnew = w_new.shape[1]
    kw, wpad = w_bins_flat.shape
    pp = pool * pool
    assert kw == pp * cnew
    base_flat = base_nhwc.reshape(n, fh * fw, cbase)              # free reshape (NHWC contiguous)
    return pl.pallas_call(
        functools.partial(_psroi_head_kernel, pool=pool, fh=fh, fw=fw, scale=scale),
        out_shape=jax.ShapeDtypeStruct((n, nr, wpad), jnp.float32),
        grid=(n,),
        in_specs=[pl.BlockSpec((1, nr, 5), lambda b: (b, 0, 0)),
                  pl.BlockSpec((1, fh * fw, cbase), lambda b: (b, 0, 0)),
                  pl.BlockSpec((cbase, cnew), lambda b: (0, 0)),
                  pl.BlockSpec((1, cnew), lambda b: (0, 0)),
                  pl.BlockSpec((kw, wpad), lambda b: (0, 0)),
                  pl.BlockSpec((pp, wpad), lambda b: (0, 0))],
        out_specs=pl.BlockSpec((1, nr, wpad), lambda b: (b, 0, 0)),
        compiler_params=pltpu.CompilerParams(
            dimension_semantics=("parallel",),
            vmem_limit_bytes=VMEM_LIMIT),
    )(rois, base_flat, w_new, b_new, w_bins_flat, b_bins)


# ----------------------------- fused softmax + consistency loss -----------------------------

def _softmax_consistency_loss_kernel(hn_ref, hf_ref, o_ref, *, n_cls, n_loc):
    """softmax on both branches, fg/bg mask, symmetric KL and masked MSE -> scalar."""
    hn = hn_ref[...]                                    # (R, 128): [cls | bbox | pad]
    hf = hf_ref[...]

    def softmax(z):
        m = jnp.max(z, axis=-1, keepdims=True)
        e = jnp.exp(z - m)
        return e * pl.reciprocal(jnp.sum(e, axis=-1, keepdims=True), approx=True)

    p = softmax(hn[:, :n_cls])
    pf = softmax(hf[:, :n_cls])

    bg = p[:, 0:1]
    fg = jnp.max(p[:, 1:n_cls], axis=-1, keepdims=True)
    m = (fg > bg).astype(jnp.float32)                   # (R, 1) foreground mask
    n_mask = jnp.sum(m)

    # symmetric KL: kl(a||b)+kl(b||a) = sum((pf-p)*(log pf - log p)); logs computed once.
    ps = p + 1e-7
    pfs = pf + 1e-7
    dlog = jnp.log(pfs) - jnp.log(ps)
    kl_sym = jnp.sum((pfs - ps) * dlog, axis=-1, keepdims=True)       # (R, 1)
    cls_loss = jnp.sum(m * kl_sym) / (2.0 * jnp.maximum(n_mask, 1.0))

    # masked MSE between bbox preds; dx of the flipped branch is negated (sign mask).
    loc_n = hn[:, n_cls:n_cls + n_loc]
    loc_f = hf[:, n_cls:n_cls + n_loc]
    sgn = jnp.where(lax.broadcasted_iota(jnp.int32, (1, n_loc), 1) % 4 == 0, -1.0, 1.0)
    diff = loc_n - loc_f * sgn
    sq = jnp.sum(diff * diff, axis=-1, keepdims=True)                 # (R, 1)
    loc_loss = jnp.sum(m * sq) / jnp.maximum(n_mask * float(n_loc), 1.0)

    total = jnp.where(n_mask > 0.0, cls_loss + loc_loss, 0.0)
    o_ref[...] = jnp.zeros((1, 1), jnp.float32) + total


def softmax_consistency_loss(head, head_flip, *, n_cls=N_CLASSES, n_loc=N_LOC):
    out = pl.pallas_call(
        functools.partial(_softmax_consistency_loss_kernel, n_cls=n_cls, n_loc=n_loc),
        out_shape=jax.ShapeDtypeStruct((1, 1), jnp.float32),
        in_specs=[VMEM_SPEC, VMEM_SPEC],
        out_specs=VMEM_SPEC,
        compiler_params=pltpu.CompilerParams(vmem_limit_bytes=VMEM_LIMIT),
    )(head, head_flip)
    return out.reshape(1)


# ----------------------------- parameters & stubs -----------------------------

def init_params(key):
    ks = jax.random.split(key, 4)

    def norm(k, shape, std):
        return std * jax.random.normal(k, shape, jnp.float32)

    params = {
        "w_base": norm(ks[0], (3, C_BASE), 0.01),
        "b_base": jnp.zeros((C_BASE,), jnp.float32),
        "w_new": norm(ks[1], (C_BASE, C_NEW), 0.01),
        "b_new": jnp.zeros((C_NEW,), jnp.float32),
        "w_cls": norm(ks[2], (C_NEW, N_CLASSES * PP), 0.01),
        "b_cls": jnp.zeros((N_CLASSES * PP,), jnp.float32),
        "w_bbox": norm(ks[3], (C_NEW, N_LOC * PP), 0.001),
        "b_bbox": jnp.zeros((N_LOC * PP,), jnp.float32),
    }
    # Hoisted derived weights: fused (cls || bbox) per-bin head weights (bf16) and
    # the conv_new weights in MXU-friendly dtypes -- built ONCE, not per forward.
    w_bins_flat, b_bins = make_bin_head_weights(
        params["w_cls"], params["b_cls"], params["w_bbox"], params["b_bbox"], POOLING_SIZE)
    params["w_bins_flat"] = w_bins_flat                        # (PP*C_NEW, 128) bf16
    params["b_bins"] = b_bins                                  # (PP, 128) f32
    params["w_new_bf16"] = params["w_new"].astype(jnp.bfloat16)
    params["b_new_row"] = params["b_new"].reshape(1, C_NEW).astype(jnp.float32)
    return params


def _generate_rois(batch, n_per, h_img, w_img):
    # TODO(synk): deterministic stand-in for the external RPN (RCNN_rpn) proposals.
    u = jax.random.uniform(jax.random.PRNGKey(42), (batch, n_per, 4), jnp.float32)
    x1 = u[..., 0] * (0.3 * w_img)
    y1 = u[..., 1] * (0.3 * h_img)
    x2 = x1 + 0.3 * w_img + u[..., 2] * (0.3 * w_img)
    y2 = y1 + 0.3 * h_img + u[..., 3] * (0.3 * h_img)
    bidx = jnp.broadcast_to(jnp.arange(batch, dtype=jnp.float32)[:, None], (batch, n_per))
    return jnp.stack([bidx, x1, y1, x2, y2], axis=-1)     # (B, NR, 5), rois[b,:,0]==b


# ----------------------------- forward (eval mode) -----------------------------

def rfcn_forward(params, im_data, im_info, gt_boxes, num_boxes, semi_check, training=False):
    del gt_boxes, num_boxes, semi_check  # only consumed by the training branch
    batch = im_data.shape[0]
    h_img, w_img = im_data.shape[2], im_data.shape[3]

    # flip(im_data, 3): reverse along width
    im_data_flip = jnp.flip(im_data, axis=3)

    # TODO(synk): full ResNet backbone (RCNN_base) replaced by stride-16 subsample + 1x1 conv stub.
    def rcnn_base(x_nchw):
        x = jnp.transpose(x_nchw[:, :, ::16, ::16], (0, 2, 3, 1))   # single NCHW->NHWC conversion
        return conv1x1_nhwc(x, params["w_base"], params["b_base"],
                            relu=True, out_dtype=jnp.bfloat16)

    base_feat = rcnn_base(im_data)
    base_feat_flip = rcnn_base(im_data_flip)

    rois = _generate_rois(batch, N_ROIS_PER_IMAGE, h_img, w_img)
    rpn_loss_cls = jnp.zeros((1,), jnp.float32)
    rpn_loss_bbox = jnp.zeros((1,), jnp.float32)
    consistency_rois = rois

    # eval path (self.training == False): no proposal-target sampling / detection losses.
    # TODO(synk): _ProposalTargetLayer / detect_loss / ohem_detect_loss (training-only) not executed.
    rois_label = jnp.zeros((1,), jnp.float32)
    rcnn_loss_cls = jnp.zeros((1,), jnp.float32)
    rcnn_loss_bbox = jnp.zeros((1,), jnp.float32)

    # Non-flipped branch: conv_new + PSRoI cls/bbox heads fused into one kernel.
    # In eval rois == consistency_rois, so the detection-path cls_score / bbox_pred
    # equal the consistency-path values -> computed exactly once.
    # (cls_prob / bbox_pred are not returned by the torch forward; softmax is fused
    #  into the loss kernel below.)
    head = psroi_heads(base_feat, rois,
                       params["w_new_bf16"], params["b_new_row"],
                       params["w_bins_flat"], params["b_bins"])              # (B, NR, 128)

    # Flipped rois (width mirror), as in the torch code.
    width = im_info[0, 1]
    rois_flip = rois.at[:, :, 1].set(width - (rois[:, :, 3] + 1.0))
    rois_flip = rois_flip.at[:, :, 3].set(width - (rois[:, :, 1] + 1.0))

    head_flip = psroi_heads(base_feat_flip, rois_flip,
                            params["w_new_bf16"], params["b_new_row"],
                            params["w_bins_flat"], params["b_bins"])         # (B, NR, 128)

    assert N_CLASSES == 21  # the torch code's .view(-1, 21) hardcodes 21 classes
    r_total = batch * rois.shape[1]
    consistency_loss = softmax_consistency_loss(
        head.reshape(r_total, HEAD_PAD), head_flip.reshape(r_total, HEAD_PAD))

    return (consistency_rois, rpn_loss_cls, rpn_loss_bbox,
            rcnn_loss_cls, rcnn_loss_bbox, rois_label, consistency_loss)


# ----------------------------- main -----------------------------

if __name__ == "__main__":
    key = jax.random.PRNGKey(0)
    k_params, k_data = jax.random.split(key)
    params = init_params(k_params)

    batch, h_img, w_img = 2, 64, 64
    im_data = jax.random.normal(k_data, (batch, 3, h_img, w_img), jnp.float32)
    im_info = jnp.tile(jnp.array([[h_img, w_img, 1.0]], jnp.float32), (batch, 1))
    gt_boxes = jnp.zeros((batch, 5, 5), jnp.float32)
    num_boxes = jnp.zeros((batch,), jnp.float32)
    semi_check = jnp.zeros((batch,), jnp.float32)

    outs = rfcn_forward(params, im_data, im_info, gt_boxes, num_boxes, semi_check, training=False)
    jax.block_until_ready(outs)
    print("KERNEL_OK")
</pallas_src>

<mosaic_0001>
module attributes {stable_mosaic.version = 11 : i64} {
  func.func @_conv1x1_kernel(%arg0: i32, %arg1: memref<32x3xbf16, #tpu.memory_space<vmem>>, %arg2: memref<3x32xbf16, #tpu.memory_space<vmem>>, %arg3: memref<1x32xf32, #tpu.memory_space<vmem>>, %arg4: memref<32x32xbf16, #tpu.memory_space<vmem>>) attributes {dimension_semantics = [#tpu.dimension_semantics<parallel>], iteration_bounds = array<i64: 1>, scalar_prefetch = 0 : i64, scratch_operands = 0 : i64, tpu.core_type = #tpu.core_type<tc>, window_params = [{transform_indices = @transform_0, window_bounds = array<i64: 32, 3>}, {pipeline_mode = #tpu.pipeline_mode<synchronous>, transform_indices = @transform_1, window_bounds = array<i64: 3, 32>}, {pipeline_mode = #tpu.pipeline_mode<synchronous>, transform_indices = @transform_2, window_bounds = array<i64: 1, 32>}, {transform_indices = @transform_3, window_bounds = array<i64: 32, 32>}]} {
    %c0 = arith.constant 0 : index
    %c0_0 = arith.constant 0 : index
    %0 = vector.load %arg1[%c0, %c0_0] : memref<32x3xbf16, #tpu.memory_space<vmem>>, vector<32x3xbf16>
    %c0_1 = arith.constant 0 : index
    %c0_2 = arith.constant 0 : index
    %1 = vector.load %arg2[%c0_1, %c0_2] : memref<3x32xbf16, #tpu.memory_space<vmem>>, vector<3x32xbf16>
    %cst = arith.constant dense<0.000000e+00> : vector<32x32xf32>
    %2 = tpu.matmul %0, %1, %cst {dimension_numbers = #tpu.dot_dimension_numbers<[1], [0], [0], [1], [0, 0, 1, 1], [], []>} : vector<32x3xbf16>, vector<3x32xbf16>, vector<32x32xf32> -> vector<32x32xf32>
    %c0_3 = arith.constant 0 : index
    %c0_4 = arith.constant 0 : index
    %3 = vector.load %arg3[%c0_3, %c0_4] : memref<1x32xf32, #tpu.memory_space<vmem>>, vector<1x32xf32>
    %4 = vector.broadcast %3 : vector<1x32xf32> to vector<32x32xf32>
    %5 = arith.addf %2, %4 : vector<32x32xf32>
    %cst_5 = arith.constant 0.000000e+00 : f32
    %6 = vector.broadcast %cst_5 : f32 to vector<32x32xf32>
    %7 = arith.maximumf %5, %6 : vector<32x32xf32>
    %8 = arith.truncf %7 : vector<32x32xf32> to vector<32x32xbf16>
    %c0_6 = arith.constant 0 : index
    %c0_7 = arith.constant 0 : index
    %9 = vector.load %arg4[%c0_6, %c0_7] : memref<32x32xbf16, #tpu.memory_space<vmem>>, vector<32x32xbf16>
    tpu.vector_store %arg4[%c0_6, %c0_7], %8 {strides = array<i32>} : memref<32x32xbf16, #tpu.memory_space<vmem>>, vector<32x32xbf16>,
    return
  }
  func.func @transform_0(%arg0: i32) -> (i32, i32) {
    %c0_i32 = arith.constant 0 : i32
    %c0_i32_0 = arith.constant 0 : i32
    return %arg0, %c0_i32 : i32, i32
  }
  func.func @transform_1(%arg0: i32) -> (i32, i32) {
    %c0_i32 = arith.constant 0 : i32
    %c0_i32_0 = arith.constant 0 : i32
    %c0_i32_1 = arith.constant 0 : i32
    return %c0_i32, %c0_i32_0 : i32, i32
  }
  func.func @transform_2(%arg0: i32) -> (i32, i32) {
    %c0_i32 = arith.constant 0 : i32
    %c0_i32_0 = arith.constant 0 : i32
    %c0_i32_1 = arith.constant 0 : i32
    return %c0_i32, %c0_i32_0 : i32, i32
  }
  func.func @transform_3(%arg0: i32) -> (i32, i32) {
    %c0_i32 = arith.constant 0 : i32
    %c0_i32_0 = arith.constant 0 : i32
    return %arg0, %c0_i32 : i32, i32
  }
}

</mosaic_0001>

<bundles_post_ra>
// kernel: tpu_custom_call.1
= control target key start
LH: loop header
LB: loop body
LE: loop exit
PB: predicated region body
PF: predicated region fallthrough
CT: control target
= control target key end

     0   :  { %vm45_vm0 = vcmask 1040384   ;;  %vm46_vm1 = vcmask 1041408   ;;  %v192_v2 = vmov 65535   ;;  %vm38_vm2 = vcmask 23552   ;;  %s235_s0 = inlined_call_operand.vmem [shape: bf16[32,3], index: 0, kind: input, shape index: {}]   ;;  %s236_s1 = inlined_call_operand.vmem [shape: bf16[3,32], index: 1, kind: input, shape index: {}]   ;;  %s237_s2 = inlined_call_operand.vmem [shape: f32[1,32], index: 2, kind: input, shape index: {}]   ;;  %s238_s3 = inlined_call_operand.hbm [shape: bf16[32,32], index: 3, kind: output, shape index: {}]  }
   0x1   :  { %v20_v0 = vld [vmem:[%s236_s1] sm:$0x3]  ;;  %v47_v3 = vsel %vm45_vm0, 4294967295, %v192_v2 }
   0x2   :  { %v168_v1 = vld [vmem:[%s235_s0] sm:$0xff]   ;;  %v48_v4 = vsel %vm46_vm1, %v47_v3, 0 }
   0x3   :  { %160 = vmatprep.mubr.msk.bf16.mxu0 %vm38_vm2, %v168_v1  ;;  %v50_v5 = vand.u32 %v48_v4, %v20_v0 }
   0x4   :  { %8 = vsyncpa [#allocation3], 0  ;;  %v169_v6 = vld [vmem:[%s235_s0 + $0x8] sm:$0xff]   ;;  %v142_v7 = vld [vmem:[%s237_s2] ss:$0 sm:$0xff]  ;;  %vm121_vm3 = vcmask 257024  }
   0x5   :  { %158 = vmatprep.subr.bf16.mxu0 %v50_v5  ;;  %s193_s0 = smov [#allocation2]  }
   0x6   :  { %159 = vmatpush3.bf16.msra.mxu0 %v50_v5  ;;  %s131_s19 = sshll.u32 %s193_s0, 4  ;;  %s132_s19 = int_to_ptr.vmem [resolvable:$true] %s131_s19 }
   0x7   :  { %s170_s2 = scalar_lea.vmem %s132_s19, 256  ;;  %p175_p1 = scmp.lt.s32.totalorder %s132_s19, %s132_s19 }
   0x8   :  { %p171_p0 = scmp.ne.s32.totalorder %s132_s19, %s170_s2  ;;  %p176_p2 = scmp.lt.s32.totalorder %s170_s2, %s170_s2 }
   0x9   :  { %161 = vmatmul.mubr.msk.bf16.vlgmr.msra.gmra.mxu0 %vm38_vm2, %v169_v6 }
   0xa   :  { %p177_p3 = por %p176_p2, %p175_p1 }
   0xc   :  { %p178_p4 = pnand %p177_p3, %p171_p0 }
  0xc9   :  { %v162_v8 = vpop.f32.mrf.mxu0 }
  0xca   :  { %v95_v9 = vadd.f32 %v162_v8, %v142_v7 }
  0xcb   :  { %v86_v10 = vpop.f32.mrf.mxu0 }
  0xcc   :  { %v103_v11 = vmax.f32 %v95_v9, 0.0  ;;  %v87_v12 = vadd.f32 %v142_v7, %v86_v10 }
  0xcd   :  { %v163_v13 = vpop.f32.mrf.mxu0 }
  0xce   :  { %v153_v14 = vpack.c.bf16 %v103_v11, %v103_v11  ;;  %v101_v15 = vmax.f32 %v87_v12, 0.0  ;;  %v98_v16 = vadd.f32 %v163_v13, %v142_v7 }
  0xcf   :  { %v89_v17 = vpop.f32.mrf.mxu0 }
  0xd0   :  { %124 = vst.msk [vmem:[#allocation2 + $0x8] sm:$0xf] %vm121_vm3, %v153_v14  ;;  %v151_v18 = vpack.c.bf16 %v101_v15, %v101_v15  ;;  %v104_v19 = vmax.f32 %v98_v16, 0.0  ;;  %v90_v20 = vadd.f32 %v142_v7, %v89_v17 }
  0xd2   :  { %122 = vst.msk [vmem:[#allocation2] sm:$0xf] %vm121_vm3, %v151_v18  ;;  %v154_v21 = vpack.c.bf16 %v104_v19, %v104_v19  ;;  %v102_v22 = vmax.f32 %v90_v20, 0.0 }
  0xd4   :  { %125 = vst.msk [vmem:[#allocation2 + $0xc] sm:$0xf] %vm121_vm3, %v154_v21  ;;  %v152_v23 = vpack.c.bf16 %v102_v22, %v102_v22 }
  0xd6   :  { %123 = vst.msk [vmem:[#allocation2 + $0x4] sm:$0xf] %vm121_vm3, %v152_v23 }
  0xd7   :  { %181 = shalt.err (!%p178_p4)
}
  0xd8   :  { %s194_s20 = smov 64   ;;  %s195_s21 = smov 4  }
  0xd9   :  { %137 = dma.vmem_to_hbm [thread:$0]  %s132_s19, 256, %s238_s3, [#allocation3], %s194_s20, %s194_s20, %s195_s21  }
  0xda   :  { %190 = dma.done.wait [#allocation3], 256  }
  0xdb   :  { %191 = vsyncadd [#allocation3], 4294967040 }
  0xdc   :  { %141 = vsyncpa [#allocation3], 1 }

</bundles_post_ra>
